<compile_context>
chip_gen: v5e
topology: v5e:2x2
jax: 0.10.0
libtpu: 0.0.40
codegen_flags: <defaults>
</compile_context>

<pallas_src>
import functools
import math

import jax
import jax.numpy as jnp
from jax.experimental import pallas as pl
from jax.experimental.pallas import tpu as pltpu

# ---------------- synthetic (scaled-down) DINOv2-s/14-like config ----------
PATCH = 14
EMBED = 128
DEPTH = 2
HEADS = 2
HEAD_DIM = EMBED // HEADS
MLP_HIDDEN = 4 * EMBED
NUM_CLASSES = 3          # linear_channels = [3]
CLS_PAD = 128            # lane-dense classifier output width (sliced to 3)
LN_EPS = 1e-6

ACT_DTYPE = jnp.bfloat16   # token activations between kernels
W_DTYPE = jnp.bfloat16     # matmul weights

_COMPILER_PARAMS = pltpu.CompilerParams(
    dimension_semantics=("parallel",),
    vmem_limit_bytes=32 * 1024 * 1024,
)


def _layernorm_f32(x, g, b, eps):
    mu = jnp.mean(x, axis=-1, keepdims=True)
    var = jnp.mean(jnp.square(x - mu), axis=-1, keepdims=True)
    return (x - mu) * jax.lax.rsqrt(var + eps) * g + b


# ---------------- kernel 1: patch embed + CLS concat + pos embed -----------
def _embed_kernel(p_ref, w_ref, b_ref, cls_ref, pos_ref, o_ref):
    # p_ref: [1, P, Kpad] bf16;  w_ref: [Kpad, D] bf16
    x = jnp.dot(p_ref[0], w_ref[...],
                preferred_element_type=jnp.float32) + b_ref[...]      # [P, D] f32
    tok = jnp.concatenate([cls_ref[...], x], axis=0) + pos_ref[...]   # [S, D]
    o_ref[0] = tok.astype(o_ref.dtype)


def pallas_patch_embed(patches, params):
    B, P, Kp = patches.shape
    S = P + 1
    return pl.pallas_call(
        _embed_kernel,
        out_shape=jax.ShapeDtypeStruct((B, S, EMBED), ACT_DTYPE),
        grid=(B,),
        in_specs=[pl.BlockSpec((1, P, Kp), lambda b: (b, 0, 0)),
                  pl.BlockSpec((Kp, EMBED), lambda b: (0, 0)),
                  pl.BlockSpec((1, EMBED), lambda b: (0, 0)),
                  pl.BlockSpec((1, EMBED), lambda b: (0, 0)),
                  pl.BlockSpec((S, EMBED), lambda b: (0, 0))],
        out_specs=pl.BlockSpec((1, S, EMBED), lambda b: (b, 0, 0)),
        compiler_params=_COMPILER_PARAMS,
    )(patches, params["patch_w"], params["patch_b"],
      params["cls_token"], params["pos_embed"])


# ---------------- kernel 2: fused attention sub-block ----------------------
def _attn_block_kernel(tok_ref, g1_ref, b1_ref, wqkv_ref, bqkv_ref,
                       wproj_ref, bproj_ref, o_ref, *, heads, head_dim, scale, eps):
    t = tok_ref[0].astype(jnp.float32)                                # [S, D]
    h = _layernorm_f32(t, g1_ref[...], b1_ref[...], eps)
    qkv = jnp.dot(h.astype(jnp.bfloat16), wqkv_ref[...],
                  preferred_element_type=jnp.float32) + bqkv_ref[...]  # [S, 3D]
    D = heads * head_dim
    q = qkv[:, 0:D]
    k = qkv[:, D:2 * D]
    v = qkv[:, 2 * D:3 * D]
    outs = []
    for hd in range(heads):                       # static per-head lane slices
        sl = slice(hd * head_dim, (hd + 1) * head_dim)
        qh, kh, vh = q[:, sl], k[:, sl], v[:, sl]
        s = jnp.dot(qh, kh.T, preferred_element_type=jnp.float32) * scale
        m = jnp.max(s, axis=-1, keepdims=True)
        p = jnp.exp(s - m)
        p = p * pl.reciprocal(jnp.sum(p, axis=-1, keepdims=True), approx=True)
        outs.append(jnp.dot(p, vh, preferred_element_type=jnp.float32))
    attn = jnp.concatenate(outs, axis=-1)                              # [S, D]
    proj = jnp.dot(attn.astype(jnp.bfloat16), wproj_ref[...],
                   preferred_element_type=jnp.float32) + bproj_ref[...]
    o_ref[0] = (t + proj).astype(o_ref.dtype)                          # residual


def pallas_attn_block(tok, blk):
    B, S, D = tok.shape
    kernel = functools.partial(_attn_block_kernel, heads=HEADS,
                               head_dim=HEAD_DIM,
                               scale=1.0 / math.sqrt(HEAD_DIM), eps=LN_EPS)
    return pl.pallas_call(
        kernel,
        out_shape=jax.ShapeDtypeStruct((B, S, D), ACT_DTYPE),
        grid=(B,),
        in_specs=[pl.BlockSpec((1, S, D), lambda b: (b, 0, 0)),
                  pl.BlockSpec((1, D), lambda b: (0, 0)),
                  pl.BlockSpec((1, D), lambda b: (0, 0)),
                  pl.BlockSpec((D, 3 * D), lambda b: (0, 0)),
                  pl.BlockSpec((1, 3 * D), lambda b: (0, 0)),
                  pl.BlockSpec((D, D), lambda b: (0, 0)),
                  pl.BlockSpec((1, D), lambda b: (0, 0))],
        out_specs=pl.BlockSpec((1, S, D), lambda b: (b, 0, 0)),
        compiler_params=_COMPILER_PARAMS,
    )(tok, blk["ln1_g"], blk["ln1_b"], blk["qkv_w"], blk["qkv_b"],
      blk["proj_w"], blk["proj_b"])


# ---------------- kernel 3: fused MLP sub-block -----------------------------
def _mlp_block_kernel(tok_ref, g2_ref, b2_ref, w1_ref, bf1_ref, w2_ref, bf2_ref,
                      o_ref, *, eps):
    t = tok_ref[0].astype(jnp.float32)                                 # [S, D]
    h = _layernorm_f32(t, g2_ref[...], b2_ref[...], eps)
    h1 = jnp.dot(h.astype(jnp.bfloat16), w1_ref[...],
                 preferred_element_type=jnp.float32) + bf1_ref[...]    # [S, 4D]
    # TODO(synk): nn.GELU defaults to exact erf-GELU; tanh approximation used here.
    h1 = jax.nn.gelu(h1, approximate=True)
    h2 = jnp.dot(h1.astype(jnp.bfloat16), w2_ref[...],
                 preferred_element_type=jnp.float32) + bf2_ref[...]    # [S, D]
    o_ref[0] = (t + h2).astype(o_ref.dtype)                            # residual


def pallas_mlp_block(tok, blk):
    B, S, D = tok.shape
    Hn = MLP_HIDDEN
    return pl.pallas_call(
        functools.partial(_mlp_block_kernel, eps=LN_EPS),
        out_shape=jax.ShapeDtypeStruct((B, S, D), ACT_DTYPE),
        grid=(B,),
        in_specs=[pl.BlockSpec((1, S, D), lambda b: (b, 0, 0)),
                  pl.BlockSpec((1, D), lambda b: (0, 0)),
                  pl.BlockSpec((1, D), lambda b: (0, 0)),
                  pl.BlockSpec((D, Hn), lambda b: (0, 0)),
                  pl.BlockSpec((1, Hn), lambda b: (0, 0)),
                  pl.BlockSpec((Hn, D), lambda b: (0, 0)),
                  pl.BlockSpec((1, D), lambda b: (0, 0))],
        out_specs=pl.BlockSpec((1, S, D), lambda b: (b, 0, 0)),
        compiler_params=_COMPILER_PARAMS,
    )(tok, blk["ln2_g"], blk["ln2_b"], blk["fc1_w"], blk["fc1_b"],
      blk["fc2_w"], blk["fc2_b"])


# ---------------- kernel 4: final LN (CLS row) + padded classifier ----------
def _head_kernel(x_ref, g_ref, b_ref, w_ref, cb_ref, o_ref, *, eps):
    x = x_ref[...].astype(jnp.float32)                                 # [B, D]
    h = _layernorm_f32(x, g_ref[...], b_ref[...], eps)
    # Dropout(0.2) is identity at inference; classifier matmul N padded to 128.
    y = jnp.dot(h.astype(jnp.bfloat16), w_ref[...],
                preferred_element_type=jnp.float32) + cb_ref[...]      # [B, 128]
    o_ref[...] = y.astype(o_ref.dtype)


def pallas_head(feat, params):
    B, D = feat.shape
    return pl.pallas_call(
        functools.partial(_head_kernel, eps=LN_EPS),
        out_shape=jax.ShapeDtypeStruct((B, CLS_PAD), jnp.float32),
        grid=(1,),
        in_specs=[pl.BlockSpec((B, D), lambda i: (0, 0)),
                  pl.BlockSpec((1, D), lambda i: (0, 0)),
                  pl.BlockSpec((1, D), lambda i: (0, 0)),
                  pl.BlockSpec((D, CLS_PAD), lambda i: (0, 0)),
                  pl.BlockSpec((1, CLS_PAD), lambda i: (0, 0))],
        out_specs=pl.BlockSpec((B, CLS_PAD), lambda i: (0, 0)),
        compiler_params=_COMPILER_PARAMS,
    )(feat, params["norm_g"], params["norm_b"],
      params["cls_w"], params["cls_b"])


# ---------------- parameters ------------------------------------------------
def init_params(key, num_patches):
    keys = iter(jax.random.split(key, 64))
    S = num_patches + 1
    K_raw = 3 * PATCH * PATCH
    K_pad = ((K_raw + 127) // 128) * 128   # 588 -> 640 (5 * 128)

    def nrm(shape, std=0.02, dtype=jnp.float32):
        return (std * jax.random.normal(next(keys), shape, jnp.float32)).astype(dtype)

    patch_w = nrm((K_raw, EMBED))
    patch_w = jnp.pad(patch_w, ((0, K_pad - K_raw), (0, 0))).astype(W_DTYPE)

    params = {
        "patch_w": patch_w,                                   # [640, D] bf16
        "patch_b": jnp.zeros((1, EMBED), jnp.float32),
        "cls_token": nrm((1, EMBED)),
        "pos_embed": nrm((S, EMBED)),
        "norm_g": jnp.ones((1, EMBED), jnp.float32),
        "norm_b": jnp.zeros((1, EMBED), jnp.float32),
        "blocks": [],
    }
    for _ in range(DEPTH):
        params["blocks"].append({
            "ln1_g": jnp.ones((1, EMBED), jnp.float32),
            "ln1_b": jnp.zeros((1, EMBED), jnp.float32),
            "qkv_w": nrm((EMBED, 3 * EMBED), dtype=W_DTYPE),
            "qkv_b": jnp.zeros((1, 3 * EMBED), jnp.float32),
            "proj_w": nrm((EMBED, EMBED), dtype=W_DTYPE),
            "proj_b": jnp.zeros((1, EMBED), jnp.float32),
            "ln2_g": jnp.ones((1, EMBED), jnp.float32),
            "ln2_b": jnp.zeros((1, EMBED), jnp.float32),
            "fc1_w": nrm((EMBED, MLP_HIDDEN), dtype=W_DTYPE),
            "fc1_b": jnp.zeros((1, MLP_HIDDEN), jnp.float32),
            "fc2_w": nrm((MLP_HIDDEN, EMBED), dtype=W_DTYPE),
            "fc2_b": jnp.zeros((1, EMBED), jnp.float32),
        })
    # classifier Linear: xavier_uniform_ weight, zero bias (as in __init__),
    # zero-padded from N=3 to N=128 for a lane-dense in-kernel output.
    bound = math.sqrt(6.0 / (EMBED + NUM_CLASSES))
    cls_w = jax.random.uniform(next(keys), (EMBED, NUM_CLASSES),
                               jnp.float32, -bound, bound)
    params["cls_w"] = jnp.pad(
        cls_w, ((0, 0), (0, CLS_PAD - NUM_CLASSES))).astype(W_DTYPE)
    params["cls_b"] = jnp.zeros((1, CLS_PAD), jnp.float32)
    return params


# ---------------- forward ----------------------------------------------------
def forward(params, x):
    # x: NCHW [B, 3, H, W]
    B, C, H, W = x.shape
    nh, nw = H // PATCH, W // PATCH
    P = nh * nw
    K_raw = C * PATCH * PATCH
    K_pad = params["patch_w"].shape[0]

    # patch-embed conv (kernel=stride=14) as im2col; zero-pad K 588 -> 640
    patches = (x.reshape(B, C, nh, PATCH, nw, PATCH)
                 .transpose(0, 2, 4, 1, 3, 5)
                 .reshape(B, P, K_raw))
    patches = jnp.pad(patches, ((0, 0), (0, 0), (0, K_pad - K_raw)))
    patches = patches.astype(ACT_DTYPE)

    # patch embed + CLS concat + pos embed (fused)
    tok = pallas_patch_embed(patches, params)            # [B, S, D] bf16

    for blk in params["blocks"]:
        tok = pallas_attn_block(tok, blk)                # LN1+QKV+attn+proj+res
        tok = pallas_mlp_block(tok, blk)                 # LN2+fc1+GELU+fc2+res

    # final norm on CLS row + classifier head (fused, padded-N output)
    feat = tok[:, 0, :]                                  # [B, D]
    logits_pad = pallas_head(feat, params)               # [B, 128] f32
    return logits_pad[:, :NUM_CLASSES]                   # [B, 3]


# ---------------- main -------------------------------------------------------
if __name__ == "__main__":
    key = jax.random.PRNGKey(0)
    pkey, xkey = jax.random.split(key)

    B, C, H, W = 2, 3, 28, 28   # small shapes; 28/14 -> 2x2 = 4 patches (+CLS)
    x = jax.random.normal(xkey, (B, C, H, W), jnp.float32)
    params = init_params(pkey, num_patches=(H // PATCH) * (W // PATCH))

    out = forward(params, x)
    out = jax.block_until_ready(out)
    assert out.shape == (B, NUM_CLASSES) and out.dtype == jnp.float32
    print("KERNEL_OK")
</pallas_src>

<mosaic_0001>
module attributes {stable_mosaic.version = 11 : i64} {
  func.func @_embed_kernel(%arg0: i32, %arg1: memref<1x4x640xbf16, #tpu.memory_space<vmem>>, %arg2: memref<640x128xbf16, #tpu.memory_space<vmem>>, %arg3: memref<1x128xf32, #tpu.memory_space<vmem>>, %arg4: memref<1x128xf32, #tpu.memory_space<vmem>>, %arg5: memref<5x128xf32, #tpu.memory_space<vmem>>, %arg6: memref<1x5x128xbf16, #tpu.memory_space<vmem>>) attributes {dimension_semantics = [#tpu.dimension_semantics<parallel>], iteration_bounds = array<i64: 2>, scalar_prefetch = 0 : i64, scratch_operands = 0 : i64, tpu.core_type = #tpu.core_type<tc>, window_params = [{transform_indices = @transform_0, window_bounds = array<i64: 1, 4, 640>}, {pipeline_mode = #tpu.pipeline_mode<synchronous>, transform_indices = @transform_1, window_bounds = array<i64: 640, 128>}, {pipeline_mode = #tpu.pipeline_mode<synchronous>, transform_indices = @transform_2, window_bounds = array<i64: 1, 128>}, {pipeline_mode = #tpu.pipeline_mode<synchronous>, transform_indices = @transform_3, window_bounds = array<i64: 1, 128>}, {pipeline_mode = #tpu.pipeline_mode<synchronous>, transform_indices = @transform_4, window_bounds = array<i64: 5, 128>}, {transform_indices = @transform_5, window_bounds = array<i64: 1, 5, 128>}]} {
    %c0 = arith.constant 0 : index
    %c0_0 = arith.constant 0 : index
    %c0_1 = arith.constant 0 : index
    %0 = vector.load %arg1[%c0, %c0_0, %c0_1] : memref<1x4x640xbf16, #tpu.memory_space<vmem>>, vector<1x4x640xbf16>
    %1 = vector.shape_cast %0 : vector<1x4x640xbf16> to vector<4x640xbf16>
    %c0_2 = arith.constant 0 : index
    %c0_3 = arith.constant 0 : index
    %2 = vector.load %arg2[%c0_2, %c0_3] : memref<640x128xbf16, #tpu.memory_space<vmem>>, vector<640x128xbf16>
    %cst = arith.constant dense<0.000000e+00> : vector<4x128xf32>
    %3 = tpu.matmul %1, %2, %cst {dimension_numbers = #tpu.dot_dimension_numbers<[1], [0], [0], [1], [0, 0, 1, 1], [], []>} : vector<4x640xbf16>, vector<640x128xbf16>, vector<4x128xf32> -> vector<4x128xf32>
    %c0_4 = arith.constant 0 : index
    %c0_5 = arith.constant 0 : index
    %4 = vector.load %arg3[%c0_4, %c0_5] : memref<1x128xf32, #tpu.memory_space<vmem>>, vector<1x128xf32>
    %5 = vector.broadcast %4 : vector<1x128xf32> to vector<4x128xf32>
    %6 = arith.addf %3, %5 : vector<4x128xf32>
    %c0_6 = arith.constant 0 : index
    %c0_7 = arith.constant 0 : index
    %7 = vector.load %arg4[%c0_6, %c0_7] : memref<1x128xf32, #tpu.memory_space<vmem>>, vector<1x128xf32>
    %8 = tpu.concatenate %7, %6 in 0 : vector<1x128xf32>, vector<4x128xf32> -> vector<5x128xf32>
    %c0_8 = arith.constant 0 : index
    %c0_9 = arith.constant 0 : index
    %9 = vector.load %arg5[%c0_8, %c0_9] : memref<5x128xf32, #tpu.memory_space<vmem>>, vector<5x128xf32>
    %10 = arith.addf %8, %9 : vector<5x128xf32>
    %11 = arith.truncf %10 : vector<5x128xf32> to vector<5x128xbf16>
    %c0_10 = arith.constant 0 : index
    %c0_11 = arith.constant 0 : index
    %c0_12 = arith.constant 0 : index
    %12 = vector.load %arg6[%c0_10, %c0_11, %c0_12] : memref<1x5x128xbf16, #tpu.memory_space<vmem>>, vector<1x5x128xbf16>
    %13 = vector.shape_cast %12 : vector<1x5x128xbf16> to vector<5x128xbf16>
    %14 = vector.shape_cast %11 : vector<5x128xbf16> to vector<1x5x128xbf16>
    tpu.vector_store %arg6[%c0_10, %c0_11, %c0_12], %14 {strides = array<i32>} : memref<1x5x128xbf16, #tpu.memory_space<vmem>>, vector<1x5x128xbf16>,
    return
  }
  func.func @transform_0(%arg0: i32) -> (i32, i32, i32) {
    %c0_i32 = arith.constant 0 : i32
    %c0_i32_0 = arith.constant 0 : i32
    %c0_i32_1 = arith.constant 0 : i32
    return %arg0, %c0_i32, %c0_i32_0 : i32, i32, i32
  }
  func.func @transform_1(%arg0: i32) -> (i32, i32) {
    %c0_i32 = arith.constant 0 : i32
    %c0_i32_0 = arith.constant 0 : i32
    %c0_i32_1 = arith.constant 0 : i32
    return %c0_i32, %c0_i32_0 : i32, i32
  }
  func.func @transform_2(%arg0: i32) -> (i32, i32) {
    %c0_i32 = arith.constant 0 : i32
    %c0_i32_0 = arith.constant 0 : i32
    %c0_i32_1 = arith.constant 0 : i32
    return %c0_i32, %c0_i32_0 : i32, i32
  }
  func.func @transform_3(%arg0: i32) -> (i32, i32) {
    %c0_i32 = arith.constant 0 : i32
    %c0_i32_0 = arith.constant 0 : i32
    %c0_i32_1 = arith.constant 0 : i32
    return %c0_i32, %c0_i32_0 : i32, i32
  }
  func.func @transform_4(%arg0: i32) -> (i32, i32) {
    %c0_i32 = arith.constant 0 : i32
    %c0_i32_0 = arith.constant 0 : i32
    %c0_i32_1 = arith.constant 0 : i32
    return %c0_i32, %c0_i32_0 : i32, i32
  }
  func.func @transform_5(%arg0: i32) -> (i32, i32, i32) {
    %c0_i32 = arith.constant 0 : i32
    %c0_i32_0 = arith.constant 0 : i32
    %c0_i32_1 = arith.constant 0 : i32
    return %arg0, %c0_i32, %c0_i32_0 : i32, i32, i32
  }
}

</mosaic_0001>

<bundles_post_ra>
// kernel: tpu_custom_call.1
= control target key start
LH: loop header
LB: loop body
LE: loop exit
PB: predicated region body
PF: predicated region fallthrough
CT: control target
= control target key end

     0   :  { %10 = vsyncpa [#allocation3], 0  ;;  %s1343_s0 = inlined_call_operand.hbm [shape: bf16[2,4,640], index: 0, kind: input, shape index: {}]   ;;  %s1344_s1 = inlined_call_operand.hbm [shape: bf16[640,128], index: 1, kind: input, shape index: {}]   ;;  %s1345_s2 = inlined_call_operand.vmem [shape: f32[1,128], index: 2, kind: input, shape index: {}]   ;;  %s1346_s3 = inlined_call_operand.vmem [shape: f32[1,128], index: 3, kind: input, shape index: {}]   ;;  %s1347_s4 = inlined_call_operand.hbm [shape: f32[5,128], index: 4, kind: input, shape index: {}]   ;;  %s1348_s5 = inlined_call_operand.vmem [shape: bf16[2,5,128], index: 5, kind: output, shape index: {}]  }
   0x1   :  { %12 = vsyncpa [#allocation3 + $0x1], 0 }
   0x2   :  { %13 = vsyncpa [#allocation5], 0  ;;  %s1221_s18 = smov 0   ;;  %s1223_s19 = smov 0  }
   0x3   :  { %s1225_s20 = smov 0   ;;  %s1227_s21 = smov 0  }
   0x4 LB: > { %s171_s24 = sshll.u32 %s1344_s1, 4  ;;  %s1245_s25 = sadd.s32 4294967295, %s1185_s21   ;;  %s1185_s21 = sphi %s1227_s21, %s1355_s21   ;;  %s1181_s20 = sphi %s1225_s20, %s1354_s20   ;;  %s1177_s19 = sphi %s1223_s19, %s1353_s19   ;;  %s1173_s18 = sphi %s1221_s18, %s1352_s18   ;;  %s172_s24 = int_to_ptr.hbm [resolvable:$true] %s171_s24 }
   0x5   : > { %p780_p0 = scmp.ge.s32.totalorder %s1185_s21, 1  ;;  %p40_p1 = scmp.eq.s32.totalorder %s1245_s25, 0 }
   0x6   : > { %p160_p2 = scmp.lt.s32.totalorder %s1185_s21, 3  ;;  %s1187_s27 = smov [#allocation4]  }
   0x7   : > { %s173_s28 = sshll.u32 %s1187_s27, 4  ;;  %s192_s6 = sshll.u32 %s1347_s4, 4  ;;  %s174_s28 = int_to_ptr.vmem [resolvable:$true] %s173_s28  ;;  %s193_s6 = int_to_ptr.hbm [resolvable:$true] %s192_s6 }
   0x8   : > { %p1250_p3 = pnand %p780_p0, %p160_p2  ;;  %s1188_s7 = smov [#allocation6]  }
   0x9   : > { %s194_s8 = sshll.u32 %s1188_s7, 4  ;;  %s1189_s9 = smov 64   ;;  %s195_s8 = int_to_ptr.vmem [resolvable:$true] %s194_s8 }
   0xa   : > { %p1004_p4 = pneg %p1250_p3  ;;  %s1190_s10 = smov 4  }
   0xb   : > { %s1262_s11 = sadd.s32 1, %s1185_s21   ;;  %s26_s12 = sadd.s32 1, %s1181_s20 }
   0xc   : > { %p1005_p5 = pnand %p1004_p4, %p40_p1  ;;  %s23_s13 = ssub.s32 %s1185_s21, %s1262_s11 }
   0xd   : > { %p33_p6 = scmp.ne.s32.totalorder %s1181_s20, %s1177_s19  ;;  %p24_p7 = scmp.eq.s32.totalorder %s23_s13, 0 }
   0xe   : > { %1007 = dma.hbm_to_vmem [thread:$0]  (!%p1005_p5), %s172_s24, 5120, %s174_s28, [#allocation5], %s1189_s9, %s1189_s9, %s1190_s10  }
   0xf   : > { %1010 = dma.hbm_to_vmem [thread:$0]  (!%p1005_p5), %s193_s6, 128, %s195_s8, [#allocation5]  }
  0x10   : > { %p34_p8 = scmp.eq.s32.totalorder %s1185_s21, 0  ;;  %p39_p9 = scmp.ne.s32.totalorder %s1177_s19, %s1173_s18 }
  0x11   : > { %p1017_p10 = scmp.lt.s32.totalorder %s1185_s21, 2  ;;  %s205_s16 = sand.u32 1, %s1181_s20  }
  0x12   : > { %s1274_s14 = scalar_select %p24_p7, %s1181_s20, %s26_s12  }
  0x13   : > { %p35_p11 = por %p34_p8, %p33_p6  ;;  %p1278_p12 = por %p40_p1, %p39_p9 }
  0x14   : > { %s992_s17 = smul.u32 10, %s1185_s21  ;;  %s206_s6 = scalar_lea.sflag [#allocation3], %s205_s16 }
  0x15   : > { %s991_s22 = smul.u32 10, %s205_s16  ;;  %p1287_p13 = pnand %p1017_p10, %p35_p11 }
  0x16   : > { %s214_s27 = scalar_lea.hbm %s1343_s0, %s992_s17  ;;  %s1124_s10 = scalar_lea.hbm %s1343_s0, 20 }
  0x17   : > { %s216_s18 = sshll.u32 %s214_s27, 4  ;;  %s209_s29 = scalar_lea.vmem [#allocation2], %s991_s22  ;;  %s217_s18 = int_to_ptr.hbm [resolvable:$true] %s216_s18 }
  0x18   : > { %s218_s30 = sshll.u32 %s209_s29, 4  ;;  %s1117_s7 = sshra.s32 %s217_s18, 4  ;;  %s219_s30 = int_to_ptr.vmem [resolvable:$true] %s218_s30  ;;  %s1118_s7 = int_to_ptr.hbm [resolvable:$true] %s1117_s7 }
  0x19   : > { %s1119_s8 = scalar_lea.hbm %s1118_s7, 10  ;;  %p1121_p2 = pneg %p1287_p13 }
  0x1a   : > { %p1120_p0 = scmp.ne.s32.totalorder %s1118_s7, %s1119_s8  ;;  %p1125_p6 = scmp.lt.s32.totalorder %s1118_s7, %s1343_s0 }
  0x1b   : > { %p1126_p7 = scmp.lt.s32.totalorder %s1124_s10, %s1119_s8 }
  0x1c   : > { %p1122_p4 = pnand %p1121_p2, %p1120_p0 }
  0x1d   : > { %p1127_p8 = por %p1126_p7, %p1125_p6 }
  0x1e   : > { %p1123_p5 = pneg %p1122_p4 }
  0x20   : > { %p1128_p9 = pnand %p1127_p8, %p1123_p5 }
  0x22   : > { %1131 = shalt.err (!%p1128_p9)
}
  0x23   : > { %1014 = dma.hbm_to_vmem [thread:$0]  (!%p1287_p13), %s217_s18, 160, %s219_s30, %s206_s6  }
  0x24   : > { %227 = sbr.rel (%p1250_p3) target bundleno = 245 (0xf5), region = 40  ;;  %s229_s16 = sand.u32 (!%p1250_p3), 1, %s1177_s19  }
  0x25   : > { %s1304_s17 = smul.u32 (!%p1250_p3), 10, %s229_s16  ;;  %s230_s22 = scalar_lea.sflag (!%p1250_p3), [#allocation3], %s229_s16 }
  0x27   : > { %s233_s23 = scalar_lea.vmem (!%p1250_p3), [#allocation2], %s1304_s17 }
  0x29   : > { %1164 = dma.done.wait (%p1278_p12), %s230_s22, 160  }
  0x2a   : > { %1166 = vsyncadd (%p1278_p12), %s230_s22, 4294967136 }
  0x2b   : > { %1168 = dma.done.wait (%p40_p1), [#allocation5], 5248  }
  0x2c   : > { %1170 = vsyncadd (%p40_p1), [#allocation5], 4294962048  ;;  %v958_v0 = vld [vmem:[#allocation4 + $0x38] sm:$0xff]  ;;  %v957_v3 = vld [vmem:[#allocation4 + $0x30] sm:$0xff]  ;;  %p270_p1 = scmp.lt.s32.totalorder %s1245_s25, 1  ;;  %vm684_vm0 = vcmask 1040384  }
  0x2d   : > { %v974_v1 = vld [vmem:[#allocation4 + $0xb8] sm:$0xff]  ;;  %615 = vmatpush.bf16.msra.mxu0 %v958_v0  ;;  %v973_v5 = vld [vmem:[#allocation4 + $0xb0] sm:$0xff]  ;;  %v956_v8 = vld [vmem:[#allocation4 + $0x28] sm:$0xff]  ;;  %vm689_vm1 = vcmask 1042432   ;;  %vm690_vm2 = vsmask.f32 2304 }
  0x2e   : > { %v982_v2 = vld [vmem:[#allocation4 + $0xf8] sm:$0xff]  ;;  %641 = vmatpush.bf16.msra.mxu2 %v974_v1  ;;  %v981_v6 = vld [vmem:[#allocation4 + $0xf0] sm:$0xff]  ;;  %v972_v9 = vld [vmem:[#allocation4 + $0xa8] sm:$0xff]  ;;  %s1357_s25 = smov (!%p270_p1, %s1245_s25), 1 }
  0x2f   : > { %v966_v4 = vld [vmem:[#allocation4 + $0x78] sm:$0xff]  ;;  %654 = vmatpush.bf16.msra.mxu3 %v982_v2  ;;  %v965_v7 = vld [vmem:[#allocation4 + $0x70] sm:$0xff]  ;;  %v980_v10 = vld [vmem:[#allocation4 + $0xe8] sm:$0xff]  ;;  %s788_s24 = sshll.u32 %s1357_s25, 2 }
  0x30   : > { %628 = vmatpush.bf16.msra.mxu1 %v966_v4  ;;  %v964_v11 = vld [vmem:[#allocation4 + $0x68] sm:$0xff]  ;;  %v955_v13 = vld [vmem:[#allocation4 + $0x20] sm:$0xff]  ;;  %v954_v17 = vld [vmem:[#allocation4 + $0x18] sm:$0xff]  ;;  %s273_s30 = scalar_lea.vmem %s1348_s5, %s788_s24 }
  0x31   : > { %616 = vmatpush.bf16.msra.mxu0 %v957_v3  ;;  %v274_v12 = vld [vmem:[%s233_s23] sm:$0xff]  ;;  %v971_v14 = vld [vmem:[#allocation4 + $0xa0] sm:$0xff]  ;;  %v275_v25 = vld [vmem:[%s233_s23 + $0x8] sm:$0x3] }
  0x32   : > { %642 = vmatpush.bf16.msra.mxu2 %v973_v5  ;;  %361 = vst [vmem:[#allocation1] ss:$4 sm:$0xff] %v274_v12  ;;  %v979_v15 = vld [vmem:[#allocation4 + $0xe0] sm:$0xff]  ;;  %v970_v18 = vld [vmem:[#allocation4 + $0x98] sm:$0xff]  ;;  %v953_v21 = vld [vmem:[#allocation4 + $0x10] sm:$0xff] }
  0x33   : > { %655 = vmatpush.bf16.msra.mxu3 %v981_v6  ;;  %v963_v16 = vld [vmem:[#allocation4 + $0x60] sm:$0xff]  ;;  %v978_v19 = vld [vmem:[#allocation4 + $0xd8] sm:$0xff]  ;;  %v969_v22 = vld [vmem:[#allocation4 + $0x90] sm:$0xff]  ;;  %364 = vst [vmem:[#allocation1 + $0x20] ss:$4 sm:$0xff] %v275_v25 }
  0x34   : > { %629 = vmatpush.bf16.msra.mxu1 %v965_v7  ;;  %v962_v20 = vld [vmem:[#allocation4 + $0x58] sm:$0xff]  ;;  %v977_v23 = vld [vmem:[#allocation4 + $0xd0] sm:$0xff]  ;;  %v952_v26 = vld [vmem:[#allocation4 + $0x8] sm:$0xff] }
  0x35   : > { %617 = vmatpush.bf16.msra.mxu0 %v956_v8  ;;  %v961_v24 = vld [vmem:[#allocation4 + $0x50] sm:$0xff]  ;;  %v968_v27 = vld [vmem:[#allocation4 + $0x88] sm:$0xff]  ;;  %v951_v30 = vld [vmem:[#allocation4] sm:$0xff] }
  0x36   : > { %643 = vmatpush.bf16.msra.mxu2 %v972_v9  ;;  %v976_v28 = vld [vmem:[#allocation4 + $0xc8] sm:$0xff]  ;;  %v990_v31 = vld [vmem:[#allocation4 + $0x138] sm:$0xff]  ;;  %v967_v32 = vld [vmem:[#allocation4 + $0x80] sm:$0xff] }
  0x37   : > { %656 = vmatpush.bf16.msra.mxu3 %v980_v10  ;;  %v960_v29 = vld [vmem:[#allocation4 + $0x48] sm:$0xff]  ;;  %v975_v33 = vld [vmem:[#allocation4 + $0xc0] sm:$0xff]  ;;  %v989_v36 = vld [vmem:[#allocation4 + $0x130] sm:$0xff] }
  0x38   : > { %630 = vmatpush.bf16.msra.mxu1 %v964_v11  ;;  %v959_v34 = vld [vmem:[#allocation4 + $0x40] sm:$0xff]  ;;  %v988_v40 = vld [vmem:[#allocation4 + $0x128] sm:$0xff]  ;;  %v986_v42 = vld [vmem:[#allocation4 + $0x118] sm:$0xff] }
  0x39   : > { %618 = vmatpush.bf16.msra.mxu0 %v955_v13  ;;  %v365_v35 = vld.sshfl [vmem:[#allocation1] sm:$0xff pattern:$0x73625140]  ;;  %v367_v37 = vld.sshfl [vmem:[#allocation1 + $0x10] sm:$0xff pattern:$0x73625140]  ;;  %vm691_vm3 = vmand %vm689_vm1, %vm690_vm2 }
  0x3a   : > { %644 = vmatpush.bf16.msra.mxu2 %v971_v14  ;;  %v368_v38 = vld.sshfl [vmem:[#allocation1 + $0x18] sm:$0xff pattern:$0x73625140]  ;;  %v366_v39 = vld.sshfl [vmem:[#allocation1 + $0x8] sm:$0xff pattern:$0x73625140] }
  0x3b   : > { %657 = vmatpush.bf16.msra.mxu3 %v979_v15  ;;  %v987_v41 = vld [vmem:[#allocation4 + $0x120] sm:$0xff]  ;;  %v985_v43 = vld [vmem:[#allocation4 + $0x110] sm:$0xff]  ;;  %v984_v44 = vld [vmem:[#allocation4 + $0x108] sm:$0xff] }
  0x3c   : > { %631 = vmatpush.bf16.msra.mxu1 %v963_v16  ;;  %v983_v45 = vld [vmem:[#allocation4 + $0x100] sm:$0xff] }
  0x3d   : > { %619 = vmatpush.bf16.msra.mxu0 %v954_v17  ;;  %v369_v46 = vld.sshfl [vmem:[#allocation1 + $0x20] sm:$0xff pattern:$0x73625140] }
  0x3e   : > { %645 = vmatpush.bf16.msra.mxu2 %v970_v18  ;;  %v1056_v53 = vld [vmem:[%s1345_s2] ss:$0 sm:$0xff] }
  0x3f   : > { %658 = vmatpush.bf16.msra.mxu3 %v978_v19  ;;  %v680_v62 = vld [vmem:[%s1346_s3] sm:$0x1] }
  0x40   : > { %632 = vmatpush.bf16.msra.mxu1 %v962_v20  ;;  %v686_v0 = vld [vmem:[#allocation6] sm:$0x1f] }
  0x41   : > { %620 = vmatpush.bf16.msra.mxu0 %v953_v21  ;;  %v692_v3 = vld [vmem:[%s273_s30] sm:$0x7] }
  0x42   : > { %646 = vmatpush.bf16.msra.mxu2 %v969_v22 }
  0x43   : > { %659 = vmatpush.bf16.msra.mxu3 %v977_v23 }
  0x44   : > { %633 = vmatpush.bf16.msra.mxu1 %v961_v24 }
  0x45   : > { %621 = vmatpush.bf16.msra.mxu0 %v952_v26 }
  0x46   : > { %647 = vmatpush.bf16.msra.mxu2 %v968_v27 }
  0x47   : > { %660 = vmatpush.bf16.msra.mxu3 %v976_v28 }
  0x48   : > { %634 = vmatpush.bf16.msra.mxu1 %v960_v29 }
  0x49   : > { %622 = vmatpush.bf16.msra.mxu0 %v951_v30 }
  0x4a   : > { %648 = vmatpush.bf16.msra.mxu2 %v967_v32 }
  0x4b   : > { %661 = vmatpush.bf16.msra.mxu3 %v975_v33 }
  0x4c   : > { %635 = vmatpush.bf16.msra.mxu1 %v959_v34  ;;  %623 = vmatmul.bf16.vlgmr.msra.gmra.mxu0 %v365_v35 }
  0x4d   : > { %667 = vmatpush.bf16.msrb.mxu0 %v990_v31  ;;  %649 = vmatmul.bf16.vlgmr.msra.gmra.mxu2 %v367_v37 }
  0x4e   : > { %662 = vmatmul.bf16.vlgmr.msra.gmra.mxu3 %v368_v38 }
  0x4f   : > { %636 = vmatmul.bf16.vlgmr.msra.gmra.mxu1 %v366_v39 }
  0x51   : > { %668 = vmatpush.bf16.msrb.mxu0 %v989_v36 }
  0x55   : > { %669 = vmatpush.bf16.msrb.mxu0 %v988_v40 }
  0x59   : > { %670 = vmatpush.bf16.msrb.mxu0 %v987_v41 }
  0x5d   : > { %671 = vmatpush.bf16.msrb.mxu0 %v986_v42 }
  0x61   : > { %672 = vmatpush.bf16.msrb.mxu0 %v985_v43 }
  0x65   : > { %673 = vmatpush.bf16.msrb.mxu0 %v984_v44 }
  0x69   : > { %674 = vmatpush.bf16.msrb.mxu0 %v983_v45 }
  0x6c   : > { %675 = vmatmul.bf16.vlgmr.msrb.gmra.mxu0 %v369_v46 }
  0xc9   : > { %v624_v47 = vpop.f32.mrf.mxu0 }
  0xca   : > { %v625_v55 = vadd.f32 %v1056_v53, %v624_v47 }
  0xcc   : > { %v637_v48 = vpop.f32.mrf.mxu1 }
  0xcd   : > { %v638_v57 = vadd.f32 %v637_v48, %v625_v55 }
  0xd0   : > { %v650_v49 = vpop.f32.mrf.mxu2 }
  0xd1   : > { %v626_v50 = vpop.f32.mrf.mxu0  ;;  %v663_v51 = vpop.f32.mrf.mxu3  ;;  %v651_v58 = vadd.f32 %v650_v49, %v638_v57 }
  0xd3   : > { %v664_v59 = vadd.f32 %v663_v51, %v651_v58 }
  0xd4   : > { %v639_v52 = vpop.f32.mrf.mxu1 }
  0xd8   : > { %v652_v54 = vpop.f32.mrf.mxu2 }
  0xd9   : > { %v665_v56 = vpop.f32.mrf.mxu3 }
  0xe9   : > { %v676_v60 = vpop.f32.mrf.mxu0 }
  0xea   : > { %v677_v61 = vadd.f32 %v676_v60, %v664_v59 }
  0xec   : > { %v682_v63 = vrot.slane %v677_v61, 7 }
  0xee   : > { %v685_v1 = vsel %vm684_vm0, %v680_v62, %v682_v63 }
  0xef   : > { %v687_v2 = vadd.f32 %v686_v0, %v685_v1 }
  0xf1   : > { %v688_v4 = vpack.c.bf16 %v687_v2, %v687_v2  ;;  %v678_v5 = vpop.f32.mrf.mxu0 }
  0xf3   : > { %v693_v6 = vsel %vm691_vm3, %v688_v4, %v692_v3 }
  0xf4   : > { %694 = vst [vmem:[%s273_s30] sm:$0x7] %v693_v6 }
  0xf5 PF: > { %p16_p3 = scmp.ge.s32.totalorder %s1262_s11, 4   ;;  %s1352_s18 = smov %s1177_s19 }
  0xf6   : > { %s1353_s19 = smov %s1181_s20  ;;  %s1354_s20 = smov %s1274_s14 }
  0xf7   : > { %s1355_s21 = smov %s1262_s11  ;;  %18 = sbr.rel (!%p16_p3) target bundleno = 4 (0x4), region = 89 }
  0xfc   :  { %714 = vsyncpa [#allocation3], 1 }
  0xfd   :  { %716 = vsyncpa [#allocation3 + $0x1], 1 }
  0xfe   :  { %717 = vsyncpa [#allocation5], 1 }

</bundles_post_ra>
